<compile_context>
chip_gen: v6e
topology: v6e:2x2x1
jax: 0.10.0
libtpu: 0.0.40
codegen_flags: <defaults>
</compile_context>

<pallas_src>
import jax
import jax.numpy as jnp
from jax import lax
from jax.experimental import pallas as pl
from jax.experimental.pallas import tpu as pltpu

B, T, V, E, H = 2, 8, 50, 96, 64   # batch, seq, vocab, embed dim, lstm hidden
V_PAD = 64                         # vocab padded so the bf16 contraction dim is tile-aligned
H4, H8 = 4 * H, 8 * H

# packed-constant lane offsets inside `misc`
OFF_B = 0                 # fused LSTM bias, both directions (8H)
OFF_WFC = H8              # fc.weight (2H)
OFF_S = H8 + 2 * H        # gate activation scale (4H)
OFF_BFC = H8 + 2 * H + H4  # fc.bias (1), rest of the 128-lane pad is zero
MISC_W = OFF_BFC + 128


def detector_kernel(ids_ref, wproj_ref, whh_ref, misc_ref, out_ref):
    # ---- fused embedding + input projection: one (T*B, V_PAD) @ (V_PAD, 8H) matmul ----
    ids = ids_ref[...]                                             # (T*B, 1) int32, time-major
    onehot = (ids == lax.broadcasted_iota(jnp.int32, (T * B, V_PAD), 1)
              ).astype(jnp.bfloat16)                               # 0/1 exact in bf16
    xw = jnp.dot(onehot, wproj_ref[...],
                 preferred_element_type=jnp.float32)               # (T*B, 8H) f32 accumulate
    xw = xw + misc_ref[:, OFF_B:OFF_B + H8]                        # fused b_ih+b_hh, both dirs
    xw = xw.reshape(T, B, H8)                                      # time-major: xw[t] contiguous

    whh = whh_ref[...]                                             # (H, 4H) bf16, hoisted
    s = misc_ref[:, OFF_S:OFF_S + H4]                              # (1, 4H) = 0.5,0.5,0.5,1.0

    # sigmoid(x) = 0.5*(tanh(x/2)+1): one EUP pass over all four gates per step.
    def gates(g):
        tt = jnp.tanh(g * s)                                       # (B, 4H), single tanh pass
        i = 0.5 * (tt[:, 0:H] + 1.0)
        f = 0.5 * (tt[:, H:2 * H] + 1.0)
        o = 0.5 * (tt[:, 2 * H:3 * H] + 1.0)
        gg = tt[:, 3 * H:4 * H]
        return i, f, o, gg

    # ---- forward direction ----
    # t = 0: h0 = c0 = 0 -> skip h @ W_hh and the f*c term (both are zero).
    i0, _, o0, gg0 = gates(xw[0][:, 0:H4])
    c = i0 * gg0
    h = o0 * jnp.tanh(c)

    # Statically unrolled recurrence: only h @ W_hh + elementwise per step.
    # (If the Mosaic dump shows the (64,256) RHS re-streamed every iteration, switch
    #  to pltpu.matmul_push_rhs / matmul_acc_lhs to hold it in the MXU weight regs.)
    for t in range(1, T):
        g = xw[t][:, 0:H4] + jnp.dot(h.astype(jnp.bfloat16), whh,
                                     preferred_element_type=jnp.float32)
        i, f, o, gg = gates(g)
        c = f * c + i * gg
        h = o * jnp.tanh(c)

    # ---- backward direction: single step on x_{T-1} from zero state ----
    ib, _, ob, ggb = gates(xw[T - 1][:, H4:H8])                    # f column unused (c0 = 0)
    cb = ib * ggb
    hb = ob * jnp.tanh(cb)

    # ---- fc([h_fwd, h_bwd]) + sigmoid on the VPU/XLU (no N=1 MXU matmuls) ----
    wfc = misc_ref[:, OFF_WFC:OFF_WFC + 2 * H]                     # (1, 2H)
    logit = (jnp.sum(h * wfc[:, 0:H], axis=1, keepdims=True)
             + jnp.sum(hb * wfc[:, H:2 * H], axis=1, keepdims=True)
             + misc_ref[:, OFF_BFC:OFF_BFC + 1])                   # (B, 1)
    out_ref[...] = jax.nn.sigmoid(logit)


@jax.jit
def lite_fake_news_detector(ids, params):
    wproj, whh, misc = params
    ids = jnp.clip(ids, 0, V - 1)                     # guard OOB token ids (PyTorch would raise)
    ids_tb = ids.T.reshape(T * B, 1).astype(jnp.int32)  # time-major rows: row = t*B + b
    n_in = 4
    return pl.pallas_call(
        detector_kernel,
        out_shape=jax.ShapeDtypeStruct((B, 1), jnp.float32),
        # Tiny footprint (~0.15 MB): grid-less, every operand whole in VMEM.
        in_specs=[pl.BlockSpec(memory_space=pltpu.MemorySpace.VMEM)
                  for _ in range(n_in)],
        out_specs=pl.BlockSpec(memory_space=pltpu.MemorySpace.VMEM),
    )(ids_tb, wproj, whh, misc)


def init_params(key):
    """Deterministic synthetic parameters with PyTorch-default-like scales,
    generated directly in the kernel's folded / gate-permuted / packed layout."""
    ks = jax.random.split(key, 10)
    k_lstm = 1.0 / jnp.sqrt(jnp.float32(H))
    k_fc = 1.0 / jnp.sqrt(jnp.float32(2 * H))

    def u(k, shape, scale):
        return jax.random.uniform(k, shape, jnp.float32, -scale, scale)

    emb = jax.random.normal(ks[0], (V, E), jnp.float32)            # Embedding ~ N(0,1)
    wih_f = u(ks[1], (E, 4 * H), k_lstm)                           # fwd, (i,f,o,g) cols
    wih_b = u(ks[2], (E, 4 * H), k_lstm)                           # bwd, (i,f,o,g) cols
    wih = jnp.concatenate([wih_f, wih_b], axis=1)                  # (E, 8H)
    # Fold the embedding through the input projection offline; pad vocab rows to V_PAD.
    wproj = (jnp.zeros((V_PAD, H8), jnp.float32)
             .at[:V].set(emb @ wih)).astype(jnp.bfloat16)          # (V_PAD, 8H) bf16
    whh = u(ks[3], (H, 4 * H), k_lstm).astype(jnp.bfloat16)        # fwd recurrent weights

    b_f = u(ks[4], (1, 4 * H), k_lstm) + u(ks[5], (1, 4 * H), k_lstm)   # b_ih + b_hh
    b_b = u(ks[6], (1, 4 * H), k_lstm) + u(ks[7], (1, 4 * H), k_lstm)
    b = jnp.concatenate([b_f, b_b], axis=1)                        # (1, 8H)
    wfc = u(ks[8], (1, 2 * H), k_fc)                               # fc.weight
    bfc = u(ks[9], (1, 1), k_fc)                                   # fc.bias
    gate_scale = jnp.concatenate([jnp.full((1, 3 * H), 0.5, jnp.float32),
                                  jnp.ones((1, H), jnp.float32)], axis=1)
    bfc_pad = jnp.concatenate([bfc, jnp.zeros((1, 127), jnp.float32)], axis=1)
    misc = jnp.concatenate([b, wfc, gate_scale, bfc_pad], axis=1)  # (1, MISC_W)
    assert misc.shape == (1, MISC_W)
    return (wproj, whh, misc)


if __name__ == "__main__":
    key = jax.random.PRNGKey(0)
    k_ids, k_params = jax.random.split(key)
    ids = jax.random.randint(k_ids, (B, T), 0, V, dtype=jnp.int32)
    params = init_params(k_params)

    out = lite_fake_news_detector(ids, params)
    jax.block_until_ready(out)
    assert out.shape == (B, 1) and out.dtype == jnp.float32
    assert bool(jnp.all(jnp.isfinite(out)))
    assert bool(jnp.all((out >= 0.0) & (out <= 1.0)))
    print("KERNEL_OK")
</pallas_src>

<mosaic_0001>
module attributes {stable_mosaic.version = 11 : i64} {
  func.func @detector_kernel(%arg0: memref<16x1xi32, #tpu.memory_space<vmem>>, %arg1: memref<64x512xbf16, #tpu.memory_space<vmem>>, %arg2: memref<64x256xbf16, #tpu.memory_space<vmem>>, %arg3: memref<1x1024xf32, #tpu.memory_space<vmem>>, %arg4: memref<2x1xf32, #tpu.memory_space<vmem>>) attributes {dimension_semantics = [], scalar_prefetch = 0 : i64, scratch_operands = 0 : i64, tpu.core_type = #tpu.core_type<tc>} {
    %c0 = arith.constant 0 : index
    %c0_0 = arith.constant 0 : index
    %0 = vector.load %arg0[%c0, %c0_0] : memref<16x1xi32, #tpu.memory_space<vmem>>, vector<16x1xi32>
    %1 = tpu.iota {dimensions = array<i32: 1>} : vector<16x64xi32>
    %2 = vector.broadcast %0 : vector<16x1xi32> to vector<16x64xi32>
    %3 = arith.cmpi eq, %2, %1 : vector<16x64xi32>
    %4 = arith.extui %3 : vector<16x64xi1> to vector<16x64xi32>
    %5 = arith.sitofp %4 : vector<16x64xi32> to vector<16x64xf32>
    %6 = arith.truncf %5 : vector<16x64xf32> to vector<16x64xbf16>
    %c0_1 = arith.constant 0 : index
    %c0_2 = arith.constant 0 : index
    %7 = vector.load %arg1[%c0_1, %c0_2] : memref<64x512xbf16, #tpu.memory_space<vmem>>, vector<64x512xbf16>
    %cst = arith.constant dense<0.000000e+00> : vector<16x512xf32>
    %8 = tpu.matmul %6, %7, %cst {dimension_numbers = #tpu.dot_dimension_numbers<[1], [0], [0], [1], [0, 0, 1, 1], [], []>} : vector<16x64xbf16>, vector<64x512xbf16>, vector<16x512xf32> -> vector<16x512xf32>
    %c0_3 = arith.constant 0 : index
    %c0_4 = arith.constant 0 : index
    %9 = vector.load %arg3[%c0_3, %c0_4] : memref<1x1024xf32, #tpu.memory_space<vmem>>, vector<1x512xf32>
    %10 = vector.broadcast %9 : vector<1x512xf32> to vector<16x512xf32>
    %11 = arith.addf %8, %10 : vector<16x512xf32>
    %12 = vector.shape_cast %11 : vector<16x512xf32> to vector<8x2x512xf32>
    %c0_5 = arith.constant 0 : index
    %c0_6 = arith.constant 0 : index
    %13 = vector.load %arg2[%c0_5, %c0_6] : memref<64x256xbf16, #tpu.memory_space<vmem>>, vector<64x256xbf16>
    %c0_7 = arith.constant 0 : index
    %c640 = arith.constant 640 : index
    %14 = vector.load %arg3[%c0_7, %c640] : memref<1x1024xf32, #tpu.memory_space<vmem>>, vector<1x256xf32>
    %15 = vector.extract_strided_slice %12 {offsets = [0, 0, 0], sizes = [1, 2, 512], strides = [1, 1, 1]} : vector<8x2x512xf32> to vector<1x2x512xf32>
    %16 = vector.shape_cast %15 : vector<1x2x512xf32> to vector<2x512xf32>
    %17 = vector.extract_strided_slice %16 {offsets = [0, 0], sizes = [2, 256], strides = [1, 1]} : vector<2x512xf32> to vector<2x256xf32>
    %18 = vector.broadcast %14 : vector<1x256xf32> to vector<2x256xf32>
    %19 = arith.mulf %17, %18 : vector<2x256xf32>
    %20 = math.tanh %19 : vector<2x256xf32>
    %21 = vector.extract_strided_slice %20 {offsets = [0, 0], sizes = [2, 64], strides = [1, 1]} : vector<2x256xf32> to vector<2x64xf32>
    %cst_8 = arith.constant 1.000000e+00 : f32
    %22 = vector.broadcast %cst_8 : f32 to vector<2x64xf32>
    %23 = arith.addf %21, %22 : vector<2x64xf32>
    %cst_9 = arith.constant 5.000000e-01 : f32
    %24 = vector.broadcast %cst_9 : f32 to vector<2x64xf32>
    %25 = arith.mulf %24, %23 : vector<2x64xf32>
    %26 = vector.extract_strided_slice %20 {offsets = [0, 128], sizes = [2, 64], strides = [1, 1]} : vector<2x256xf32> to vector<2x64xf32>
    %cst_10 = arith.constant 1.000000e+00 : f32
    %27 = vector.broadcast %cst_10 : f32 to vector<2x64xf32>
    %28 = arith.addf %26, %27 : vector<2x64xf32>
    %cst_11 = arith.constant 5.000000e-01 : f32
    %29 = vector.broadcast %cst_11 : f32 to vector<2x64xf32>
    %30 = arith.mulf %29, %28 : vector<2x64xf32>
    %31 = vector.extract_strided_slice %20 {offsets = [0, 192], sizes = [2, 64], strides = [1, 1]} : vector<2x256xf32> to vector<2x64xf32>
    %32 = arith.mulf %25, %31 : vector<2x64xf32>
    %33 = math.tanh %32 : vector<2x64xf32>
    %34 = arith.mulf %30, %33 : vector<2x64xf32>
    %35 = vector.extract_strided_slice %12 {offsets = [1, 0, 0], sizes = [1, 2, 512], strides = [1, 1, 1]} : vector<8x2x512xf32> to vector<1x2x512xf32>
    %36 = vector.shape_cast %35 : vector<1x2x512xf32> to vector<2x512xf32>
    %37 = vector.extract_strided_slice %36 {offsets = [0, 0], sizes = [2, 256], strides = [1, 1]} : vector<2x512xf32> to vector<2x256xf32>
    %38 = arith.truncf %34 : vector<2x64xf32> to vector<2x64xbf16>
    %cst_12 = arith.constant dense<0.000000e+00> : vector<2x256xf32>
    %39 = tpu.matmul %38, %13, %cst_12 {dimension_numbers = #tpu.dot_dimension_numbers<[1], [0], [0], [1], [0, 0, 1, 1], [], []>} : vector<2x64xbf16>, vector<64x256xbf16>, vector<2x256xf32> -> vector<2x256xf32>
    %40 = arith.addf %37, %39 : vector<2x256xf32>
    %41 = vector.broadcast %14 : vector<1x256xf32> to vector<2x256xf32>
    %42 = arith.mulf %40, %41 : vector<2x256xf32>
    %43 = math.tanh %42 : vector<2x256xf32>
    %44 = vector.extract_strided_slice %43 {offsets = [0, 0], sizes = [2, 64], strides = [1, 1]} : vector<2x256xf32> to vector<2x64xf32>
    %cst_13 = arith.constant 1.000000e+00 : f32
    %45 = vector.broadcast %cst_13 : f32 to vector<2x64xf32>
    %46 = arith.addf %44, %45 : vector<2x64xf32>
    %cst_14 = arith.constant 5.000000e-01 : f32
    %47 = vector.broadcast %cst_14 : f32 to vector<2x64xf32>
    %48 = arith.mulf %47, %46 : vector<2x64xf32>
    %49 = vector.extract_strided_slice %43 {offsets = [0, 64], sizes = [2, 64], strides = [1, 1]} : vector<2x256xf32> to vector<2x64xf32>
    %cst_15 = arith.constant 1.000000e+00 : f32
    %50 = vector.broadcast %cst_15 : f32 to vector<2x64xf32>
    %51 = arith.addf %49, %50 : vector<2x64xf32>
    %cst_16 = arith.constant 5.000000e-01 : f32
    %52 = vector.broadcast %cst_16 : f32 to vector<2x64xf32>
    %53 = arith.mulf %52, %51 : vector<2x64xf32>
    %54 = vector.extract_strided_slice %43 {offsets = [0, 128], sizes = [2, 64], strides = [1, 1]} : vector<2x256xf32> to vector<2x64xf32>
    %cst_17 = arith.constant 1.000000e+00 : f32
    %55 = vector.broadcast %cst_17 : f32 to vector<2x64xf32>
    %56 = arith.addf %54, %55 : vector<2x64xf32>
    %cst_18 = arith.constant 5.000000e-01 : f32
    %57 = vector.broadcast %cst_18 : f32 to vector<2x64xf32>
    %58 = arith.mulf %57, %56 : vector<2x64xf32>
    %59 = vector.extract_strided_slice %43 {offsets = [0, 192], sizes = [2, 64], strides = [1, 1]} : vector<2x256xf32> to vector<2x64xf32>
    %60 = arith.mulf %53, %32 : vector<2x64xf32>
    %61 = arith.mulf %48, %59 : vector<2x64xf32>
    %62 = arith.addf %60, %61 : vector<2x64xf32>
    %63 = math.tanh %62 : vector<2x64xf32>
    %64 = arith.mulf %58, %63 : vector<2x64xf32>
    %65 = vector.extract_strided_slice %12 {offsets = [2, 0, 0], sizes = [1, 2, 512], strides = [1, 1, 1]} : vector<8x2x512xf32> to vector<1x2x512xf32>
    %66 = vector.shape_cast %65 : vector<1x2x512xf32> to vector<2x512xf32>
    %67 = vector.extract_strided_slice %66 {offsets = [0, 0], sizes = [2, 256], strides = [1, 1]} : vector<2x512xf32> to vector<2x256xf32>
    %68 = arith.truncf %64 : vector<2x64xf32> to vector<2x64xbf16>
    %cst_19 = arith.constant dense<0.000000e+00> : vector<2x256xf32>
    %69 = tpu.matmul %68, %13, %cst_19 {dimension_numbers = #tpu.dot_dimension_numbers<[1], [0], [0], [1], [0, 0, 1, 1], [], []>} : vector<2x64xbf16>, vector<64x256xbf16>, vector<2x256xf32> -> vector<2x256xf32>
    %70 = arith.addf %67, %69 : vector<2x256xf32>
    %71 = vector.broadcast %14 : vector<1x256xf32> to vector<2x256xf32>
    %72 = arith.mulf %70, %71 : vector<2x256xf32>
    %73 = math.tanh %72 : vector<2x256xf32>
    %74 = vector.extract_strided_slice %73 {offsets = [0, 0], sizes = [2, 64], strides = [1, 1]} : vector<2x256xf32> to vector<2x64xf32>
    %cst_20 = arith.constant 1.000000e+00 : f32
    %75 = vector.broadcast %cst_20 : f32 to vector<2x64xf32>
    %76 = arith.addf %74, %75 : vector<2x64xf32>
    %cst_21 = arith.constant 5.000000e-01 : f32
    %77 = vector.broadcast %cst_21 : f32 to vector<2x64xf32>
    %78 = arith.mulf %77, %76 : vector<2x64xf32>
    %79 = vector.extract_strided_slice %73 {offsets = [0, 64], sizes = [2, 64], strides = [1, 1]} : vector<2x256xf32> to vector<2x64xf32>
    %cst_22 = arith.constant 1.000000e+00 : f32
    %80 = vector.broadcast %cst_22 : f32 to vector<2x64xf32>
    %81 = arith.addf %79, %80 : vector<2x64xf32>
    %cst_23 = arith.constant 5.000000e-01 : f32
    %82 = vector.broadcast %cst_23 : f32 to vector<2x64xf32>
    %83 = arith.mulf %82, %81 : vector<2x64xf32>
    %84 = vector.extract_strided_slice %73 {offsets = [0, 128], sizes = [2, 64], strides = [1, 1]} : vector<2x256xf32> to vector<2x64xf32>
    %cst_24 = arith.constant 1.000000e+00 : f32
    %85 = vector.broadcast %cst_24 : f32 to vector<2x64xf32>
    %86 = arith.addf %84, %85 : vector<2x64xf32>
    %cst_25 = arith.constant 5.000000e-01 : f32
    %87 = vector.broadcast %cst_25 : f32 to vector<2x64xf32>
    %88 = arith.mulf %87, %86 : vector<2x64xf32>
    %89 = vector.extract_strided_slice %73 {offsets = [0, 192], sizes = [2, 64], strides = [1, 1]} : vector<2x256xf32> to vector<2x64xf32>
    %90 = arith.mulf %83, %62 : vector<2x64xf32>
    %91 = arith.mulf %78, %89 : vector<2x64xf32>
    %92 = arith.addf %90, %91 : vector<2x64xf32>
    %93 = math.tanh %92 : vector<2x64xf32>
    %94 = arith.mulf %88, %93 : vector<2x64xf32>
    %95 = vector.extract_strided_slice %12 {offsets = [3, 0, 0], sizes = [1, 2, 512], strides = [1, 1, 1]} : vector<8x2x512xf32> to vector<1x2x512xf32>
    %96 = vector.shape_cast %95 : vector<1x2x512xf32> to vector<2x512xf32>
    %97 = vector.extract_strided_slice %96 {offsets = [0, 0], sizes = [2, 256], strides = [1, 1]} : vector<2x512xf32> to vector<2x256xf32>
    %98 = arith.truncf %94 : vector<2x64xf32> to vector<2x64xbf16>
    %cst_26 = arith.constant dense<0.000000e+00> : vector<2x256xf32>
    %99 = tpu.matmul %98, %13, %cst_26 {dimension_numbers = #tpu.dot_dimension_numbers<[1], [0], [0], [1], [0, 0, 1, 1], [], []>} : vector<2x64xbf16>, vector<64x256xbf16>, vector<2x256xf32> -> vector<2x256xf32>
    %100 = arith.addf %97, %99 : vector<2x256xf32>
    %101 = vector.broadcast %14 : vector<1x256xf32> to vector<2x256xf32>
    %102 = arith.mulf %100, %101 : vector<2x256xf32>
    %103 = math.tanh %102 : vector<2x256xf32>
    %104 = vector.extract_strided_slice %103 {offsets = [0, 0], sizes = [2, 64], strides = [1, 1]} : vector<2x256xf32> to vector<2x64xf32>
    %cst_27 = arith.constant 1.000000e+00 : f32
    %105 = vector.broadcast %cst_27 : f32 to vector<2x64xf32>
    %106 = arith.addf %104, %105 : vector<2x64xf32>
    %cst_28 = arith.constant 5.000000e-01 : f32
    %107 = vector.broadcast %cst_28 : f32 to vector<2x64xf32>
    %108 = arith.mulf %107, %106 : vector<2x64xf32>
    %109 = vector.extract_strided_slice %103 {offsets = [0, 64], sizes = [2, 64], strides = [1, 1]} : vector<2x256xf32> to vector<2x64xf32>
    %cst_29 = arith.constant 1.000000e+00 : f32
    %110 = vector.broadcast %cst_29 : f32 to vector<2x64xf32>
    %111 = arith.addf %109, %110 : vector<2x64xf32>
    %cst_30 = arith.constant 5.000000e-01 : f32
    %112 = vector.broadcast %cst_30 : f32 to vector<2x64xf32>
    %113 = arith.mulf %112, %111 : vector<2x64xf32>
    %114 = vector.extract_strided_slice %103 {offsets = [0, 128], sizes = [2, 64], strides = [1, 1]} : vector<2x256xf32> to vector<2x64xf32>
    %cst_31 = arith.constant 1.000000e+00 : f32
    %115 = vector.broadcast %cst_31 : f32 to vector<2x64xf32>
    %116 = arith.addf %114, %115 : vector<2x64xf32>
    %cst_32 = arith.constant 5.000000e-01 : f32
    %117 = vector.broadcast %cst_32 : f32 to vector<2x64xf32>
    %118 = arith.mulf %117, %116 : vector<2x64xf32>
    %119 = vector.extract_strided_slice %103 {offsets = [0, 192], sizes = [2, 64], strides = [1, 1]} : vector<2x256xf32> to vector<2x64xf32>
    %120 = arith.mulf %113, %92 : vector<2x64xf32>
    %121 = arith.mulf %108, %119 : vector<2x64xf32>
    %122 = arith.addf %120, %121 : vector<2x64xf32>
    %123 = math.tanh %122 : vector<2x64xf32>
    %124 = arith.mulf %118, %123 : vector<2x64xf32>
    %125 = vector.extract_strided_slice %12 {offsets = [4, 0, 0], sizes = [1, 2, 512], strides = [1, 1, 1]} : vector<8x2x512xf32> to vector<1x2x512xf32>
    %126 = vector.shape_cast %125 : vector<1x2x512xf32> to vector<2x512xf32>
    %127 = vector.extract_strided_slice %126 {offsets = [0, 0], sizes = [2, 256], strides = [1, 1]} : vector<2x512xf32> to vector<2x256xf32>
    %128 = arith.truncf %124 : vector<2x64xf32> to vector<2x64xbf16>
    %cst_33 = arith.constant dense<0.000000e+00> : vector<2x256xf32>
    %129 = tpu.matmul %128, %13, %cst_33 {dimension_numbers = #tpu.dot_dimension_numbers<[1], [0], [0], [1], [0, 0, 1, 1], [], []>} : vector<2x64xbf16>, vector<64x256xbf16>, vector<2x256xf32> -> vector<2x256xf32>
    %130 = arith.addf %127, %129 : vector<2x256xf32>
    %131 = vector.broadcast %14 : vector<1x256xf32> to vector<2x256xf32>
    %132 = arith.mulf %130, %131 : vector<2x256xf32>
    %133 = math.tanh %132 : vector<2x256xf32>
    %134 = vector.extract_strided_slice %133 {offsets = [0, 0], sizes = [2, 64], strides = [1, 1]} : vector<2x256xf32> to vector<2x64xf32>
    %cst_34 = arith.constant 1.000000e+00 : f32
    %135 = vector.broadcast %cst_34 : f32 to vector<2x64xf32>
    %136 = arith.addf %134, %135 : vector<2x64xf32>
    %cst_35 = arith.constant 5.000000e-01 : f32
    %137 = vector.broadcast %cst_35 : f32 to vector<2x64xf32>
    %138 = arith.mulf %137, %136 : vector<2x64xf32>
    %139 = vector.extract_strided_slice %133 {offsets = [0, 64], sizes = [2, 64], strides = [1, 1]} : vector<2x256xf32> to vector<2x64xf32>
    %cst_36 = arith.constant 1.000000e+00 : f32
    %140 = vector.broadcast %cst_36 : f32 to vector<2x64xf32>
    %141 = arith.addf %139, %140 : vector<2x64xf32>
    %cst_37 = arith.constant 5.000000e-01 : f32
    %142 = vector.broadcast %cst_37 : f32 to vector<2x64xf32>
    %143 = arith.mulf %142, %141 : vector<2x64xf32>
    %144 = vector.extract_strided_slice %133 {offsets = [0, 128], sizes = [2, 64], strides = [1, 1]} : vector<2x256xf32> to vector<2x64xf32>
    %cst_38 = arith.constant 1.000000e+00 : f32
    %145 = vector.broadcast %cst_38 : f32 to vector<2x64xf32>
    %146 = arith.addf %144, %145 : vector<2x64xf32>
    %cst_39 = arith.constant 5.000000e-01 : f32
    %147 = vector.broadcast %cst_39 : f32 to vector<2x64xf32>
    %148 = arith.mulf %147, %146 : vector<2x64xf32>
    %149 = vector.extract_strided_slice %133 {offsets = [0, 192], sizes = [2, 64], strides = [1, 1]} : vector<2x256xf32> to vector<2x64xf32>
    %150 = arith.mulf %143, %122 : vector<2x64xf32>
    %151 = arith.mulf %138, %149 : vector<2x64xf32>
    %152 = arith.addf %150, %151 : vector<2x64xf32>
    %153 = math.tanh %152 : vector<2x64xf32>
    %154 = arith.mulf %148, %153 : vector<2x64xf32>
    %155 = vector.extract_strided_slice %12 {offsets = [5, 0, 0], sizes = [1, 2, 512], strides = [1, 1, 1]} : vector<8x2x512xf32> to vector<1x2x512xf32>
    %156 = vector.shape_cast %155 : vector<1x2x512xf32> to vector<2x512xf32>
    %157 = vector.extract_strided_slice %156 {offsets = [0, 0], sizes = [2, 256], strides = [1, 1]} : vector<2x512xf32> to vector<2x256xf32>
    %158 = arith.truncf %154 : vector<2x64xf32> to vector<2x64xbf16>
    %cst_40 = arith.constant dense<0.000000e+00> : vector<2x256xf32>
    %159 = tpu.matmul %158, %13, %cst_40 {dimension_numbers = #tpu.dot_dimension_numbers<[1], [0], [0], [1], [0, 0, 1, 1], [], []>} : vector<2x64xbf16>, vector<64x256xbf16>, vector<2x256xf32> -> vector<2x256xf32>
    %160 = arith.addf %157, %159 : vector<2x256xf32>
    %161 = vector.broadcast %14 : vector<1x256xf32> to vector<2x256xf32>
    %162 = arith.mulf %160, %161 : vector<2x256xf32>
    %163 = math.tanh %162 : vector<2x256xf32>
    %164 = vector.extract_strided_slice %163 {offsets = [0, 0], sizes = [2, 64], strides = [1, 1]} : vector<2x256xf32> to vector<2x64xf32>
    %cst_41 = arith.constant 1.000000e+00 : f32
    %165 = vector.broadcast %cst_41 : f32 to vector<2x64xf32>
    %166 = arith.addf %164, %165 : vector<2x64xf32>
    %cst_42 = arith.constant 5.000000e-01 : f32
    %167 = vector.broadcast %cst_42 : f32 to vector<2x64xf32>
    %168 = arith.mulf %167, %166 : vector<2x64xf32>
    %169 = vector.extract_strided_slice %163 {offsets = [0, 64], sizes = [2, 64], strides = [1, 1]} : vector<2x256xf32> to vector<2x64xf32>
    %cst_43 = arith.constant 1.000000e+00 : f32
    %170 = vector.broadcast %cst_43 : f32 to vector<2x64xf32>
    %171 = arith.addf %169, %170 : vector<2x64xf32>
    %cst_44 = arith.constant 5.000000e-01 : f32
    %172 = vector.broadcast %cst_44 : f32 to vector<2x64xf32>
    %173 = arith.mulf %172, %171 : vector<2x64xf32>
    %174 = vector.extract_strided_slice %163 {offsets = [0, 128], sizes = [2, 64], strides = [1, 1]} : vector<2x256xf32> to vector<2x64xf32>
    %cst_45 = arith.constant 1.000000e+00 : f32
    %175 = vector.broadcast %cst_45 : f32 to vector<2x64xf32>
    %176 = arith.addf %174, %175 : vector<2x64xf32>
    %cst_46 = arith.constant 5.000000e-01 : f32
    %177 = vector.broadcast %cst_46 : f32 to vector<2x64xf32>
    %178 = arith.mulf %177, %176 : vector<2x64xf32>
    %179 = vector.extract_strided_slice %163 {offsets = [0, 192], sizes = [2, 64], strides = [1, 1]} : vector<2x256xf32> to vector<2x64xf32>
    %180 = arith.mulf %173, %152 : vector<2x64xf32>
    %181 = arith.mulf %168, %179 : vector<2x64xf32>
    %182 = arith.addf %180, %181 : vector<2x64xf32>
    %183 = math.tanh %182 : vector<2x64xf32>
    %184 = arith.mulf %178, %183 : vector<2x64xf32>
    %185 = vector.extract_strided_slice %12 {offsets = [6, 0, 0], sizes = [1, 2, 512], strides = [1, 1, 1]} : vector<8x2x512xf32> to vector<1x2x512xf32>
    %186 = vector.shape_cast %185 : vector<1x2x512xf32> to vector<2x512xf32>
    %187 = vector.extract_strided_slice %186 {offsets = [0, 0], sizes = [2, 256], strides = [1, 1]} : vector<2x512xf32> to vector<2x256xf32>
    %188 = arith.truncf %184 : vector<2x64xf32> to vector<2x64xbf16>
    %cst_47 = arith.constant dense<0.000000e+00> : vector<2x256xf32>
    %189 = tpu.matmul %188, %13, %cst_47 {dimension_numbers = #tpu.dot_dimension_numbers<[1], [0], [0], [1], [0, 0, 1, 1], [], []>} : vector<2x64xbf16>, vector<64x256xbf16>, vector<2x256xf32> -> vector<2x256xf32>
    %190 = arith.addf %187, %189 : vector<2x256xf32>
    %191 = vector.broadcast %14 : vector<1x256xf32> to vector<2x256xf32>
    %192 = arith.mulf %190, %191 : vector<2x256xf32>
    %193 = math.tanh %192 : vector<2x256xf32>
    %194 = vector.extract_strided_slice %193 {offsets = [0, 0], sizes = [2, 64], strides = [1, 1]} : vector<2x256xf32> to vector<2x64xf32>
    %cst_48 = arith.constant 1.000000e+00 : f32
    %195 = vector.broadcast %cst_48 : f32 to vector<2x64xf32>
    %196 = arith.addf %194, %195 : vector<2x64xf32>
    %cst_49 = arith.constant 5.000000e-01 : f32
    %197 = vector.broadcast %cst_49 : f32 to vector<2x64xf32>
    %198 = arith.mulf %197, %196 : vector<2x64xf32>
    %199 = vector.extract_strided_slice %193 {offsets = [0, 64], sizes = [2, 64], strides = [1, 1]} : vector<2x256xf32> to vector<2x64xf32>
    %cst_50 = arith.constant 1.000000e+00 : f32
    %200 = vector.broadcast %cst_50 : f32 to vector<2x64xf32>
    %201 = arith.addf %199, %200 : vector<2x64xf32>
    %cst_51 = arith.constant 5.000000e-01 : f32
    %202 = vector.broadcast %cst_51 : f32 to vector<2x64xf32>
    %203 = arith.mulf %202, %201 : vector<2x64xf32>
    %204 = vector.extract_strided_slice %193 {offsets = [0, 128], sizes = [2, 64], strides = [1, 1]} : vector<2x256xf32> to vector<2x64xf32>
    %cst_52 = arith.constant 1.000000e+00 : f32
    %205 = vector.broadcast %cst_52 : f32 to vector<2x64xf32>
    %206 = arith.addf %204, %205 : vector<2x64xf32>
    %cst_53 = arith.constant 5.000000e-01 : f32
    %207 = vector.broadcast %cst_53 : f32 to vector<2x64xf32>
    %208 = arith.mulf %207, %206 : vector<2x64xf32>
    %209 = vector.extract_strided_slice %193 {offsets = [0, 192], sizes = [2, 64], strides = [1, 1]} : vector<2x256xf32> to vector<2x64xf32>
    %210 = arith.mulf %203, %182 : vector<2x64xf32>
    %211 = arith.mulf %198, %209 : vector<2x64xf32>
    %212 = arith.addf %210, %211 : vector<2x64xf32>
    %213 = math.tanh %212 : vector<2x64xf32>
    %214 = arith.mulf %208, %213 : vector<2x64xf32>
    %215 = vector.extract_strided_slice %12 {offsets = [7, 0, 0], sizes = [1, 2, 512], strides = [1, 1, 1]} : vector<8x2x512xf32> to vector<1x2x512xf32>
    %216 = vector.shape_cast %215 : vector<1x2x512xf32> to vector<2x512xf32>
    %217 = vector.extract_strided_slice %216 {offsets = [0, 0], sizes = [2, 256], strides = [1, 1]} : vector<2x512xf32> to vector<2x256xf32>
    %218 = arith.truncf %214 : vector<2x64xf32> to vector<2x64xbf16>
    %cst_54 = arith.constant dense<0.000000e+00> : vector<2x256xf32>
    %219 = tpu.matmul %218, %13, %cst_54 {dimension_numbers = #tpu.dot_dimension_numbers<[1], [0], [0], [1], [0, 0, 1, 1], [], []>} : vector<2x64xbf16>, vector<64x256xbf16>, vector<2x256xf32> -> vector<2x256xf32>
    %220 = arith.addf %217, %219 : vector<2x256xf32>
    %221 = vector.broadcast %14 : vector<1x256xf32> to vector<2x256xf32>
    %222 = arith.mulf %220, %221 : vector<2x256xf32>
    %223 = math.tanh %222 : vector<2x256xf32>
    %224 = vector.extract_strided_slice %223 {offsets = [0, 0], sizes = [2, 64], strides = [1, 1]} : vector<2x256xf32> to vector<2x64xf32>
    %cst_55 = arith.constant 1.000000e+00 : f32
    %225 = vector.broadcast %cst_55 : f32 to vector<2x64xf32>
    %226 = arith.addf %224, %225 : vector<2x64xf32>
    %cst_56 = arith.constant 5.000000e-01 : f32
    %227 = vector.broadcast %cst_56 : f32 to vector<2x64xf32>
    %228 = arith.mulf %227, %226 : vector<2x64xf32>
    %229 = vector.extract_strided_slice %223 {offsets = [0, 64], sizes = [2, 64], strides = [1, 1]} : vector<2x256xf32> to vector<2x64xf32>
    %cst_57 = arith.constant 1.000000e+00 : f32
    %230 = vector.broadcast %cst_57 : f32 to vector<2x64xf32>
    %231 = arith.addf %229, %230 : vector<2x64xf32>
    %cst_58 = arith.constant 5.000000e-01 : f32
    %232 = vector.broadcast %cst_58 : f32 to vector<2x64xf32>
    %233 = arith.mulf %232, %231 : vector<2x64xf32>
    %234 = vector.extract_strided_slice %223 {offsets = [0, 128], sizes = [2, 64], strides = [1, 1]} : vector<2x256xf32> to vector<2x64xf32>
    %cst_59 = arith.constant 1.000000e+00 : f32
    %235 = vector.broadcast %cst_59 : f32 to vector<2x64xf32>
    %236 = arith.addf %234, %235 : vector<2x64xf32>
    %cst_60 = arith.constant 5.000000e-01 : f32
    %237 = vector.broadcast %cst_60 : f32 to vector<2x64xf32>
    %238 = arith.mulf %237, %236 : vector<2x64xf32>
    %239 = vector.extract_strided_slice %223 {offsets = [0, 192], sizes = [2, 64], strides = [1, 1]} : vector<2x256xf32> to vector<2x64xf32>
    %240 = arith.mulf %233, %212 : vector<2x64xf32>
    %241 = arith.mulf %228, %239 : vector<2x64xf32>
    %242 = arith.addf %240, %241 : vector<2x64xf32>
    %243 = math.tanh %242 : vector<2x64xf32>
    %244 = arith.mulf %238, %243 : vector<2x64xf32>
    %245 = vector.extract_strided_slice %12 {offsets = [7, 0, 0], sizes = [1, 2, 512], strides = [1, 1, 1]} : vector<8x2x512xf32> to vector<1x2x512xf32>
    %246 = vector.shape_cast %245 : vector<1x2x512xf32> to vector<2x512xf32>
    %247 = vector.extract_strided_slice %246 {offsets = [0, 256], sizes = [2, 256], strides = [1, 1]} : vector<2x512xf32> to vector<2x256xf32>
    %248 = vector.broadcast %14 : vector<1x256xf32> to vector<2x256xf32>
    %249 = arith.mulf %247, %248 : vector<2x256xf32>
    %250 = math.tanh %249 : vector<2x256xf32>
    %251 = vector.extract_strided_slice %250 {offsets = [0, 0], sizes = [2, 64], strides = [1, 1]} : vector<2x256xf32> to vector<2x64xf32>
    %cst_61 = arith.constant 1.000000e+00 : f32
    %252 = vector.broadcast %cst_61 : f32 to vector<2x64xf32>
    %253 = arith.addf %251, %252 : vector<2x64xf32>
    %cst_62 = arith.constant 5.000000e-01 : f32
    %254 = vector.broadcast %cst_62 : f32 to vector<2x64xf32>
    %255 = arith.mulf %254, %253 : vector<2x64xf32>
    %256 = vector.extract_strided_slice %250 {offsets = [0, 128], sizes = [2, 64], strides = [1, 1]} : vector<2x256xf32> to vector<2x64xf32>
    %cst_63 = arith.constant 1.000000e+00 : f32
    %257 = vector.broadcast %cst_63 : f32 to vector<2x64xf32>
    %258 = arith.addf %256, %257 : vector<2x64xf32>
    %cst_64 = arith.constant 5.000000e-01 : f32
    %259 = vector.broadcast %cst_64 : f32 to vector<2x64xf32>
    %260 = arith.mulf %259, %258 : vector<2x64xf32>
    %261 = vector.extract_strided_slice %250 {offsets = [0, 192], sizes = [2, 64], strides = [1, 1]} : vector<2x256xf32> to vector<2x64xf32>
    %262 = arith.mulf %255, %261 : vector<2x64xf32>
    %263 = math.tanh %262 : vector<2x64xf32>
    %264 = arith.mulf %260, %263 : vector<2x64xf32>
    %c0_65 = arith.constant 0 : index
    %c512 = arith.constant 512 : index
    %265 = vector.load %arg3[%c0_65, %c512] : memref<1x1024xf32, #tpu.memory_space<vmem>>, vector<1x128xf32>
    %266 = vector.extract_strided_slice %265 {offsets = [0, 0], sizes = [1, 64], strides = [1, 1]} : vector<1x128xf32> to vector<1x64xf32>
    %267 = vector.broadcast %266 : vector<1x64xf32> to vector<2x64xf32>
    %268 = arith.mulf %244, %267 : vector<2x64xf32>
    %cst_66 = arith.constant dense<0.000000e+00> : vector<2xf32>
    %269 = vector.multi_reduction <add>, %268, %cst_66 [1] : vector<2x64xf32> to vector<2xf32>
    %270 = vector.shape_cast %269 : vector<2xf32> to vector<2x1xf32>
    %271 = vector.extract_strided_slice %265 {offsets = [0, 64], sizes = [1, 64], strides = [1, 1]} : vector<1x128xf32> to vector<1x64xf32>
    %272 = vector.broadcast %271 : vector<1x64xf32> to vector<2x64xf32>
    %273 = arith.mulf %264, %272 : vector<2x64xf32>
    %cst_67 = arith.constant dense<0.000000e+00> : vector<2xf32>
    %274 = vector.multi_reduction <add>, %273, %cst_67 [1] : vector<2x64xf32> to vector<2xf32>
    %275 = vector.shape_cast %274 : vector<2xf32> to vector<2x1xf32>
    %276 = arith.addf %270, %275 : vector<2x1xf32>
    %c0_68 = arith.constant 0 : index
    %c896 = arith.constant 896 : index
    %277 = vector.load %arg3[%c0_68, %c896] : memref<1x1024xf32, #tpu.memory_space<vmem>>, vector<1x1xf32>
    %278 = vector.broadcast %277 : vector<1x1xf32> to vector<2x1xf32>
    %279 = arith.addf %276, %278 : vector<2x1xf32>
    %280 = arith.negf %279 : vector<2x1xf32>
    %281 = math.exp %280 : vector<2x1xf32>
    %cst_69 = arith.constant 1.000000e+00 : f32
    %282 = vector.broadcast %cst_69 : f32 to vector<2x1xf32>
    %283 = arith.addf %282, %281 : vector<2x1xf32>
    %284 = arith.divf %282, %283 : vector<2x1xf32>
    %c0_70 = arith.constant 0 : index
    %c0_71 = arith.constant 0 : index
    %285 = vector.load %arg4[%c0_70, %c0_71] : memref<2x1xf32, #tpu.memory_space<vmem>>, vector<2x1xf32>
    tpu.vector_store %arg4[%c0_70, %c0_71], %284 {strides = array<i32>} : memref<2x1xf32, #tpu.memory_space<vmem>>, vector<2x1xf32>,
    return
  }
}

</mosaic_0001>

<bundles_post_ra>
// kernel: lite_fake_news_detector.1
= control target key start
LH: loop header
LB: loop body
LE: loop exit
PB: predicated region body
PF: predicated region fallthrough
CT: control target
= control target key end

     0   :  { %9 = vsyncpa [#allocation3], 0  ;;  %s1527_s0 = inlined_call_operand.vmem [shape: s32[16,1], index: 0, kind: input, shape index: {}]   ;;  %s1528_s1 = inlined_call_operand.hbm [shape: bf16[64,512], index: 1, kind: input, shape index: {}]   ;;  %s1529_s2 = inlined_call_operand.hbm [shape: bf16[64,256], index: 2, kind: input, shape index: {}]   ;;  %s1530_s3 = inlined_call_operand.vmem [shape: f32[1,1024], index: 3, kind: input, shape index: {}]   ;;  %s1531_s4 = inlined_call_operand.vmem [shape: f32[2,1], index: 4, kind: output, shape index: {}]  }
   0x1   :  { %10 = vsyncpa [#allocation5], 0  ;;  %s1263_s15 = smov [#allocation2]  }
   0x2   :  { %s18_s16 = sshll.u32 %s1263_s15, 4  ;;  %s19_s16 = int_to_ptr.vmem [resolvable:$true] %s18_s16 }
   0x3   :  { %s1227_s17 = scalar_lea.vmem %s19_s16, 2048  ;;  %p1232_p1 = scmp.lt.s32.totalorder %s19_s16, %s19_s16 }
   0x4   :  { %p1228_p0 = scmp.ne.s32.totalorder %s19_s16, %s1227_s17  ;;  %p1233_p2 = scmp.lt.s32.totalorder %s1227_s17, %s1227_s17 }
   0x6   :  { %p1234_p3 = por %p1233_p2, %p1232_p1 }
   0x8   :  { %p1235_p4 = pnand %p1234_p3, %p1228_p0 }
   0xa   :  { %1238 = shalt.err (!%p1235_p4)
}
   0xb   :  { %s1264_s18 = smov 256   ;;  %s1265_s19 = smov 16  }
   0xc   :  { %24 = dma.hbm_to_vmem [thread:$0]  %s1528_s1, 2048, %s19_s16, [#allocation3], %s1264_s18, %s1264_s18, %s1265_s19  }
   0xd   :  { %s1266_s22 = smov [#allocation4]  }
   0xe   :  { %s30_s23 = sshll.u32 %s1266_s22, 4  ;;  %s31_s23 = int_to_ptr.vmem [resolvable:$true] %s30_s23 }
   0xf   :  { %s1247_s24 = scalar_lea.vmem %s31_s23, 1024  ;;  %p1252_p6 = scmp.lt.s32.totalorder %s31_s23, %s31_s23 }
  0x10   :  { %p1248_p5 = scmp.ne.s32.totalorder %s31_s23, %s1247_s24  ;;  %p1253_p7 = scmp.lt.s32.totalorder %s1247_s24, %s1247_s24 }
  0x12   :  { %p1254_p8 = por %p1253_p7, %p1252_p6 }
  0x14   :  { %p1255_p9 = pnand %p1254_p8, %p1248_p5 }
  0x16   :  { %1258 = shalt.err (!%p1255_p9)
}
  0x17   :  { %s1267_s25 = smov 128   ;;  %s1268_s26 = smov 8  }
  0x18   :  { %36 = dma.hbm_to_vmem [thread:$0]  %s1529_s2, 1024, %s31_s23, [#allocation5], %s1267_s25, %s1267_s25, %s1268_s26  }
  0x19   :  { %1259 = dma.done.wait [#allocation3], 2048  }
  0x1a   :  { %1260 = vsyncadd [#allocation3], 4294965248 }
  0x1b   :  { %1261 = dma.done.wait [#allocation5], 1024  }
  0x1c   :  { %1262 = vsyncadd [#allocation5], 4294966272  ;;  %v1269_v0 = vmov 0   ;;  %v46_v1 = vld [vmem:[%s1527_s0] sm:$0xff]  ;;  %v47_v2 = vld [vmem:[%s1527_s0 + $0x8] sm:$0xff]  ;;  %v48_v19 = vlaneseq  ;;  %v1270_v23 = vmov 0.0  }
  0x1d   :  { %1142 = vset.pattern.permute.xlu0 %v1269_v0  ;;  %217 = vmatprep.mubr.bf16.mxu0 %v1269_v0  ;;  %v1143_v3 = vld [vmem:[#allocation2 + $0x64] ss:$16 sps:$4 sm:$0xff]   ;;  %v1145_v4 = vld [vmem:[#allocation2 + $0x6c] ss:$16 sps:$4 sm:$0xff]   ;;  %v1147_v5 = vld [vmem:[#allocation2 + $0x60] ss:$16 sps:$4 sm:$0xff]  }
  0x1e   :  { %260 = vmatprep.mubr.bf16.mxu1 %v1269_v0  ;;  %51 = vperm.xlu0 %1142, %v46_v1   ;;  %v1148_v6 = vld [vmem:[#allocation2 + $0x68] ss:$16 sps:$4 sm:$0xff]   ;;  %v1149_v7 = vld [vmem:[#allocation2 + $0x44] ss:$16 sps:$4 sm:$0xff]   ;;  %v1151_v8 = vld [vmem:[#allocation2 + $0x4c] ss:$16 sps:$4 sm:$0xff]  }
  0x1f   :  { %193 = vmatprep.subr.bf16.mxu0 %v1143_v3  ;;  %236 = vmatprep.subr.bf16.mxu1 %v1145_v4  ;;  %v1153_v9 = vld [vmem:[#allocation2 + $0x40] ss:$16 sps:$4 sm:$0xff]   ;;  %v1154_v10 = vld [vmem:[#allocation2 + $0x48] ss:$16 sps:$4 sm:$0xff]   ;;  %v1155_v11 = vld [vmem:[#allocation2 + $0x24] ss:$16 sps:$4 sm:$0xff]  }
  0x20   :  { %194 = vmatpush1.bf16.msra.mxu0 %v1147_v5  ;;  %237 = vmatpush1.bf16.msra.mxu1 %v1148_v6  ;;  %v1157_v12 = vld [vmem:[#allocation2 + $0x2c] ss:$16 sps:$4 sm:$0xff]   ;;  %v1159_v13 = vld [vmem:[#allocation2 + $0x20] ss:$16 sps:$4 sm:$0xff]   ;;  %v1160_v14 = vld [vmem:[#allocation2 + $0x28] ss:$16 sps:$4 sm:$0xff]  }
  0x21   :  { %195 = vmatprep.subr.bf16.mxu0 %v1149_v7  ;;  %238 = vmatprep.subr.bf16.mxu1 %v1151_v8  ;;  %v1161_v15 = vld [vmem:[#allocation2 + $0x4] ss:$16 sps:$4 sm:$0xff]   ;;  %v1163_v16 = vld [vmem:[#allocation2 + $0xc] ss:$16 sps:$4 sm:$0xff]   ;;  %v1165_v17 = vld [vmem:[#allocation2] ss:$16 sps:$4 sm:$0xff]  }
  0x22   :  { %54 = vperm.xlu0 %1142, %v47_v2   ;;  %v1166_v18 = vld [vmem:[#allocation2 + $0x8] ss:$16 sps:$4 sm:$0xff]   ;;  %v49_v20 = vand.u32 127, %v48_v19  ;;  %vm181_vm2 = vcmask 523264   ;;  %v82_v27 = vshrl.u32 %v48_v19, 7  ;;  %s1272_s8 = smov 64  }
  0x23   :  { %v1271_v28 = vmov 1983009808   ;;  %v367_v31 = vld [vmem:[%s1530_s3 + $0x5] sm:$0x3]  ;;  %v79_v35 = vld [vmem:[%s1530_s3] sm:$0xf] }
  0x24   :  { %196 = vmatpush1.bf16.msra.mxu0 %v1153_v9  ;;  %239 = vmatpush1.bf16.msra.mxu1 %v1154_v10  ;;  %v284_v29 = vunpack.c.l.s4 %v1271_v28  ;;  %v83_v30 = vsub.s32 0, %v82_v27  ;;  %v91_v32 = vsub.s32 2, %v82_v27  ;;  %v87_v33 = vsub.s32 1, %v82_v27  ;;  %v1384_v28 = vld [vmem:[#allocation4 + $0x14] ss:$8 sps:$4 sm:$0xff]  }
  0x25   :  { %197 = vmatprep.subr.bf16.mxu0 %v1155_v11  ;;  %240 = vmatprep.subr.bf16.mxu1 %v1157_v12  ;;  %v95_v34 = vsub.s32 3, %v82_v27  ;;  %vm1053_vm3 = vcmask 517120   ;;  %vm1086_vm4 = vcmask 1024  }
  0x26   :  { %v285_v36 = vunpack.c.0.s8 %v284_v29  ;;  %v372_v37 = vrot.slane %v367_v31, %v83_v30  ;;  %v376_v38 = vrot.slane %v367_v31, %v87_v33  ;;  %v84_v39 = vrot.slane %v79_v35, %v83_v30  ;;  %v1388_v29 = vld [vmem:[#allocation4 + $0x10] ss:$8 sps:$4 sm:$0xff]   ;;  %v1392_v31 = vld [vmem:[#allocation4 + $0x4] ss:$8 sps:$4 sm:$0xff]  }
  0x27   :  { %v92_v40 = vrot.slane %v79_v35, %v91_v32  ;;  %v88_v41 = vrot.slane %v79_v35, %v87_v33  ;;  %v96_v42 = vrot.slane %v79_v35, %v95_v34  ;;  %v1397_v32 = vld [vmem:[#allocation4] ss:$8 sps:$4 sm:$0xff]  }
  0x28   :  { %198 = vmatpush1.bf16.msra.mxu0 %v1159_v13  ;;  %241 = vmatpush1.bf16.msra.mxu1 %v1160_v14  ;;  %v1323_v45 = vsub.s32 %v285_v36, %v82_v27  ;;  %v377_v47 = vcombine.low %v372_v37, %v376_v38  ;;  %v1380_v27 = vld [vmem:[#allocation4 + $0x20] ss:$8 sps:$4 sm:$0xff]  }
  0x29   :  { %199 = vmatprep.subr.bf16.mxu0 %v1161_v15  ;;  %242 = vmatprep.subr.bf16.mxu1 %v1163_v16 }
  0x2a   :  { %v1326_v59 = vrot.slane %v377_v47, %v1323_v45 }
  0x2c   :  { %200 = vmatpush1.bf16.msra.mxu0 %v1165_v17  ;;  %243 = vmatpush1.bf16.msra.mxu1 %v1166_v18 }
  0x99   :  { %v52_v21 = vpop.permute.xlu0 %51 }
  0x9a   :  { %vm56_vm0 = vcmp.eq.s32.totalorder %v52_v21, %v49_v20 }
  0x9b   :  { %v1094_v24 = vsel %vm56_vm0, 1.0, %v1270_v23 }
  0x9d   :  { %v55_v22 = vpop.permute.xlu0 %54 }
  0x9e   :  { %vm57_vm1 = vcmp.eq.s32.totalorder %v55_v22, %v49_v20 }
  0x9f   :  { %v1095_v25 = vsel %vm57_vm1, 1.0, %v1270_v23 }
  0xa0   :  { %v62_v26 = vpack.c.bf16 %v1095_v25, %v1094_v24  ;;  %v1371_v24 = vld [vmem:[#allocation4 + $0x34] ss:$8 sps:$4 sm:$0xff]   ;;  %v1373_v25 = vld [vmem:[#allocation4 + $0x30] ss:$8 sps:$4 sm:$0xff]  }
  0xa1   :  { %454 = vmatprep.subr.bf16.mxu0 %v1371_v24  ;;  %541 = vmatprep.subr.bf16.mxu1 %v1371_v24 }
  0xa2   :  { %1112 = vmatmul.mubr.msk.bf16.vlgmr.msra.gmra.mxu0 %vm181_vm2, %v62_v26  ;;  %1113 = vmatmul.mubr.msk.bf16.vlgmr.msra.gmra.mxu1 %vm181_vm2, %v62_v26  ;;  %v1375_v26 = vld [vmem:[#allocation4 + $0x24] ss:$8 sps:$4 sm:$0xff]  }
  0xa3   :  { %478 = vmatprep.mubr.bf16.mxu0 %v1269_v0  ;;  %565 = vmatprep.mubr.bf16.mxu1 %v1269_v0 }
  0xa4   :  { %455 = vmatpush1.bf16.msra.mxu0 %v1373_v25  ;;  %542 = vmatpush1.bf16.msra.mxu1 %v1373_v25 }
  0xa5   :  { %456 = vmatprep.subr.bf16.mxu0 %v1375_v26  ;;  %543 = vmatprep.subr.bf16.mxu1 %v1375_v26 }
  0xa8   :  { %457 = vmatpush1.bf16.msra.mxu0 %v1380_v27  ;;  %544 = vmatpush1.bf16.msra.mxu1 %v1380_v27 }
  0xa9   :  { %458 = vmatprep.subr.bf16.mxu0 %v1384_v28  ;;  %545 = vmatprep.subr.bf16.mxu1 %v1384_v28 }
  0xac   :  { %459 = vmatpush1.bf16.msra.mxu0 %v1388_v29  ;;  %546 = vmatpush1.bf16.msra.mxu1 %v1388_v29 }
  0xad   :  { %460 = vmatprep.subr.bf16.mxu0 %v1392_v31  ;;  %547 = vmatprep.subr.bf16.mxu1 %v1392_v31 }
  0xb0   :  { %461 = vmatpush1.bf16.msra.mxu0 %v1397_v32  ;;  %548 = vmatpush1.bf16.msra.mxu1 %v1397_v32 }
  0xb1   :  { %624 = vmatprep.subr.bf16.mxu0 %v1371_v24  ;;  %707 = vmatprep.subr.bf16.mxu1 %v1371_v24 }
 0x162   :  { %v219_v43 = vpop.f32.mrf.mxu0  ;;  %v262_v44 = vpop.f32.mrf.mxu1 }
 0x163   :  { %v220_v49 = vadd.f32 %v219_v43, %v84_v39  ;;  %v263_v50 = vadd.f32 %v262_v44, %v92_v40 }
 0x164   :  { %v221_v46 = vpop.f32.mrf.mxu0  ;;  %v264_v48 = vpop.f32.mrf.mxu1 }
 0x165   :  { %v222_v51 = vadd.f32 %v221_v46, %v88_v41  ;;  %v265_v52 = vadd.f32 %v264_v48, %v96_v42 }
 0x166   :  { %v223_v53 = vpop.f32.mrf.mxu0  ;;  %v266_v54 = vpop.f32.mrf.mxu1 }
 0x167   :  { %v279_v55 = vcombine.low %v220_v49, %v222_v51  ;;  %v280_v56 = vcombine.high %v220_v49, %v222_v51  ;;  %v281_v57 = vcombine.low %v263_v50, %v265_v52  ;;  %v282_v58 = vcombine.high %v263_v50, %v265_v52 }
 0x168   :  { %v224_v60 = vadd.f32 %v223_v53, %v84_v39  ;;  %v267_v61 = vadd.f32 %v266_v54, %v92_v40  ;;  %v225_v62 = vpop.f32.mrf.mxu0  ;;  %v268_v63 = vpop.f32.mrf.mxu1 }
 0x169   :  { %v1329_v1 = vrot.slane %v279_v55, %v1323_v45  ;;  %v1332_v2 = vrot.slane %v280_v56, %v1323_v45  ;;  %v1335_v3 = vrot.slane %v281_v57, %v1323_v45  ;;  %v1338_v4 = vrot.slane %v282_v58, %v1323_v45 }
 0x16a   :  { %v226_v5 = vadd.f32 %v225_v62, %v88_v41  ;;  %v269_v6 = vadd.f32 %v268_v63, %v96_v42 }
 0x16b   :  { %v311_v7 = vcombine.low %v1329_v1, %v1335_v3  ;;  %v312_v8 = vcombine.high %v1329_v1, %v1335_v3  ;;  %v313_v9 = vcombine.low %v1332_v2, %v1338_v4  ;;  %v314_v10 = vcombine.high %v1332_v2, %v1338_v4 }
 0x16c   :  { %v315_v11 = vcombine.low %v224_v60, %v226_v5  ;;  %v316_v12 = vcombine.high %v224_v60, %v226_v5  ;;  %v317_v13 = vcombine.low %v267_v61, %v269_v6  ;;  %v318_v14 = vcombine.high %v267_v61, %v269_v6 }
 0x16d   :  { %v386_v15 = vmul.f32 %v1326_v59, %v311_v7 }
 0x16e   :  { %v1350_v16 = vrot.slane %v315_v11, %v1323_v45  ;;  %v1353_v17 = vrot.slane %v316_v12, %v1323_v45  ;;  %v1356_v18 = vrot.slane %v317_v13, %v1323_v45  ;;  %v1359_v19 = vrot.slane %v318_v14, %v1323_v45 }
 0x16f   :  { %1179 = vtanh.f32 %v386_v15 }
 0x170   :  { %v347_v20 = vcombine.low %v1350_v16, %v1356_v18  ;;  %v348_v21 = vcombine.high %v1350_v16, %v1356_v18  ;;  %v349_v22 = vcombine.low %v1353_v17, %v1359_v19  ;;  %v1369_v23 = vcombine.high %v1353_v17, %v1359_v19 }
 0x17c   :  { %v1180_v30 = vpop.eup %1179 }
 0x17d   :  { %395 = vrot.lane.b32.xlu1 %v1180_v30, %s1272_s8  ;;  %v388_v33 = vadd.f32 1.0, %v1180_v30  ;;  %v391_v38 = vrot.slane %v1180_v30, 2 }
 0x17f   :  { %v389_v35 = vmul.f32 0.5, %v388_v33  ;;  %v393_v39 = vadd.f32 1.0, %v391_v38 }
 0x181   :  { %v394_v40 = vmul.f32 0.5, %v393_v39 }
 0x1ef   :  { %v396_v34 = vpop.permute.xlu1 %395 }
 0x1f0   :  { %v397_v36 = vrot.slane %v396_v34, 2 }
 0x1f2   :  { %v399_v37 = vmul.f32 %v397_v36, %v389_v35 }
 0x1f4   :  { %1181 = vtanh.f32 %v399_v37  ;;  %509 = vrot.lane.b32.xlu0 %v399_v37, %s1272_s8 }
 0x201   :  { %v1182_v41 = vpop.eup %1181 }
 0x202   :  { %v401_v42 = vmul.f32 %v1182_v41, %v394_v40 }
 0x204   :  { %v402_v43 = vpack.c.bf16 %v401_v42, %v401_v42 }
 0x206   :  { %1122 = vmatmul.mubr.msk.bf16.vlgmr.msra.gmra.mxu0 %vm181_vm2, %v402_v43 }
 0x207   :  { %625 = vmatpush1.bf16.msra.mxu0 %v1373_v25  ;;  %648 = vmatprep.mubr.bf16.mxu0 %v1269_v0 }
 0x208   :  { %626 = vmatprep.subr.bf16.mxu0 %v1375_v26 }
 0x20b   :  { %627 = vmatpush1.bf16.msra.mxu0 %v1380_v27 }
 0x20c   :  { %628 = vmatprep.subr.bf16.mxu0 %v1384_v28 }
 0x20f   :  { %629 = vmatpush1.bf16.msra.mxu0 %v1388_v29 }
 0x210   :  { %630 = vmatprep.subr.bf16.mxu0 %v1392_v31 }
 0x213   :  { %631 = vmatpush1.bf16.msra.mxu0 %v1397_v32 }
 0x214   :  { %790 = vmatprep.subr.bf16.mxu0 %v1371_v24 }
 0x266   :  { %v510_v60 = vpop.permute.xlu0 %509 }
 0x2c6   :  { %v480_v44 = vpop.f32.mrf.mxu0 }
 0x2c8   :  { %v482_v46 = vpop.f32.mrf.mxu0 }
 0x2c9   :  { %v489_v47 = vcombine.low %v480_v44, %v482_v46 }
 0x2ca   :  { %v484_v48 = vpop.f32.mrf.mxu0 }
 0x2cb   :  { %v496_v49 = vrot.slane %v489_v47, %v1323_v45 }
 0x2cc   :  { %v485_v50 = vpop.f32.mrf.mxu0 }
 0x2cd   :  { %v498_v51 = vadd.f32 %v496_v49, %v312_v8 }
 0x2cf   :  { %v499_v52 = vmul.f32 %v498_v51, %v1326_v59 }
 0x2d1   :  { %1183 = vtanh.f32 %v499_v52 }
 0x2de   :  { %v1184_v53 = vpop.eup %1183 }
 0x2df   :  { %513 = vrot.lane.b32.xlu1 %v1184_v53, %s1272_s8  ;;  %v501_v54 = vadd.f32 1.0, %v1184_v53  ;;  %v504_v3 = vrot.slane %v1184_v53, 2 }
 0x2e1   :  { %v502_v56 = vmul.f32 0.5, %v501_v54  ;;  %v506_v5 = vadd.f32 1.0, %v504_v3 }
 0x2e3   :  { %v512_v61 = vmul.f32 %v510_v60, %v502_v56  ;;  %v507_v6 = vmul.f32 0.5, %v506_v5 }
 0x351   :  { %v514_v55 = vpop.permute.xlu1 %513 }
 0x352   :  { %v515_v57 = vrot.slane %v514_v55, 2 }
 0x354   :  { %v517_v58 = vmul.f32 %v515_v57, %v502_v56 }
 0x356   :  { %519 = vrot.lane.b32.xlu1 %v517_v58, %s1272_s8 }
 0x3c8   :  { %v520_v62 = vpop.permute.xlu1 %519 }
 0x3c9   :  { %v522_v63 = vadd.f32 %v520_v62, %v512_v61 }
 0x3cb   :  { %1185 = vtanh.f32 %v522_v63 }
 0x3d8   :  { %v1186_v1 = vpop.eup %1185 }
 0x3d9   :  { %525 = vrot.lane.b32.xlu0 %v1186_v1, %s1272_s8 }
 0x44b   :  { %v526_v7 = vpop.permute.xlu0 %525 }
 0x44c   :  { %v528_v8 = vmul.f32 %v526_v7, %v507_v6 }
 0x44e   :  { %v529_v11 = vpack.c.bf16 %v528_v8, %v528_v8 }
 0x450   :  { %1123 = vmatmul.mubr.msk.bf16.vlgmr.msra.gmra.mxu1 %vm181_vm2, %v529_v11 }
 0x451   :  { %708 = vmatpush1.bf16.msra.mxu1 %v1373_v25  ;;  %731 = vmatprep.mubr.bf16.mxu1 %v1269_v0 }
 0x452   :  { %709 = vmatprep.subr.bf16.mxu1 %v1375_v26 }
 0x455   :  { %710 = vmatpush1.bf16.msra.mxu1 %v1380_v27 }
 0x456   :  { %711 = vmatprep.subr.bf16.mxu1 %v1384_v28 }
 0x459   :  { %712 = vmatpush1.bf16.msra.mxu1 %v1388_v29 }
 0x45a   :  { %713 = vmatprep.subr.bf16.mxu1 %v1392_v31 }
 0x45d   :  { %714 = vmatpush1.bf16.msra.mxu1 %v1397_v32 }
 0x45e   :  { %873 = vmatprep.subr.bf16.mxu1 %v1371_v24 }
 0x510   :  { %v567_v12 = vpop.f32.mrf.mxu1 }
 0x512   :  { %v569_v13 = vpop.f32.mrf.mxu1 }
 0x513   :  { %v576_v14 = vcombine.low %v567_v12, %v569_v13 }
 0x514   :  { %v571_v15 = vpop.f32.mrf.mxu1 }
 0x515   :  { %v583_v30 = vrot.slane %v576_v14, %v1323_v45 }
 0x516   :  { %v572_v33 = vpop.f32.mrf.mxu1 }
 0x517   :  { %v585_v34 = vadd.f32 %v583_v30, %v313_v9 }
 0x519   :  { %v586_v35 = vmul.f32 %v585_v34, %v1326_v59 }
 0x51b   :  { %1187 = vtanh.f32 %v586_v35 }
 0x528   :  { %v1188_v36 = vpop.eup %1187 }
 0x529   :  { %596 = vrot.lane.b32.xlu1 %v1188_v36, %s1272_s8  ;;  %v588_v37 = vadd.f32 1.0, %v1188_v36  ;;  %v591_v9 = vrot.slane %v1188_v36, 2 }
 0x52b   :  { %v589_v39 = vmul.f32 0.5, %v588_v37  ;;  %v593_v47 = vadd.f32 1.0, %v591_v9 }
 0x52d   :  { %v595_v42 = vmul.f32 %v589_v39, %v522_v63  ;;  %v594_v48 = vmul.f32 0.5, %v593_v47 }
 0x59b   :  { %v597_v38 = vpop.permute.xlu1 %596 }
 0x59c   :  { %v598_v40 = vrot.slane %v597_v38, 2 }
 0x59e   :  { %v600_v41 = vmul.f32 %v598_v40, %v589_v39 }
 0x5a0   :  { %602 = vrot.lane.b32.xlu0 %v600_v41, %s1272_s8 }
 0x612   :  { %v603_v43 = vpop.permute.xlu0 %602 }
 0x613   :  { %v605_v44 = vadd.f32 %v603_v43, %v595_v42 }
 0x615   :  { %1189 = vtanh.f32 %v605_v44 }
 0x622   :  { %v1190_v46 = vpop.eup %1189 }
 0x623   :  { %608 = vrot.lane.b32.xlu1 %v1190_v46, %s1272_s8 }
 0x695   :  { %v609_v49 = vpop.permute.xlu1 %608 }
 0x696   :  { %v611_v50 = vmul.f32 %v609_v49, %v594_v48 }
 0x698   :  { %v612_v51 = vpack.c.bf16 %v611_v50, %v611_v50 }
 0x69a   :  { %1124 = vmatmul.mubr.msk.bf16.vlgmr.msra.gmra.mxu0 %vm181_vm2, %v612_v51 }
 0x69b   :  { %791 = vmatpush1.bf16.msra.mxu0 %v1373_v25  ;;  %814 = vmatprep.mubr.bf16.mxu0 %v1269_v0 }
 0x69c   :  { %792 = vmatprep.subr.bf16.mxu0 %v1375_v26 }
 0x69f   :  { %793 = vmatpush1.bf16.msra.mxu0 %v1380_v27 }
 0x6a0   :  { %794 = vmatprep.subr.bf16.mxu0 %v1384_v28 }
 0x6a3   :  { %795 = vmatpush1.bf16.msra.mxu0 %v1388_v29 }
 0x6a4   :  { %796 = vmatprep.subr.bf16.mxu0 %v1392_v31 }
 0x6a7   :  { %797 = vmatpush1.bf16.msra.mxu0 %v1397_v32 }
 0x6a8   :  { %956 = vmatprep.subr.bf16.mxu0 %v1371_v24 }
 0x75a   :  { %v650_v52 = vpop.f32.mrf.mxu0 }
 0x75c   :  { %v652_v53 = vpop.f32.mrf.mxu0 }
 0x75d   :  { %v659_v54 = vcombine.low %v650_v52, %v652_v53 }
 0x75e   :  { %v654_v55 = vpop.f32.mrf.mxu0 }
 0x75f   :  { %v666_v56 = vrot.slane %v659_v54, %v1323_v45 }
 0x760   :  { %v655_v57 = vpop.f32.mrf.mxu0 }
 0x761   :  { %v668_v58 = vadd.f32 %v666_v56, %v314_v10 }
 0x763   :  { %v669_v60 = vmul.f32 %v668_v58, %v1326_v59 }
 0x765   :  { %1191 = vtanh.f32 %v669_v60 }
 0x772   :  { %v1192_v61 = vpop.eup %1191 }
 0x773   :  { %679 = vrot.lane.b32.xlu0 %v1192_v61, %s1272_s8  ;;  %v671_v62 = vadd.f32 1.0, %v1192_v61  ;;  %v674_v2 = vrot.slane %v1192_v61, 2 }
 0x775   :  { %v672_v24 = vmul.f32 0.5, %v671_v62  ;;  %v676_v4 = vadd.f32 1.0, %v674_v2 }
 0x777   :  { %v678_v5 = vmul.f32 %v672_v24, %v605_v44  ;;  %v677_v10 = vmul.f32 0.5, %v676_v4 }
 0x7e5   :  { %v680_v63 = vpop.permute.xlu0 %679 }
 0x7e6   :  { %v681_v1 = vrot.slane %v680_v63, 2 }
 0x7e8   :  { %v683_v3 = vmul.f32 %v681_v1, %v672_v24 }
 0x7ea   :  { %685 = vrot.lane.b32.xlu1 %v683_v3, %s1272_s8 }
 0x85c   :  { %v686_v6 = vpop.permute.xlu1 %685 }
 0x85d   :  { %v688_v7 = vadd.f32 %v686_v6, %v678_v5 }
 0x85f   :  { %1193 = vtanh.f32 %v688_v7 }
 0x86c   :  { %v1194_v8 = vpop.eup %1193 }
 0x86d   :  { %691 = vrot.lane.b32.xlu0 %v1194_v8, %s1272_s8 }
 0x8df   :  { %v692_v11 = vpop.permute.xlu0 %691 }
 0x8e0   :  { %v694_v12 = vmul.f32 %v692_v11, %v677_v10 }
 0x8e2   :  { %v695_v13 = vpack.c.bf16 %v694_v12, %v694_v12 }
 0x8e4   :  { %1125 = vmatmul.mubr.msk.bf16.vlgmr.msra.gmra.mxu1 %vm181_vm2, %v695_v13 }
 0x8e5   :  { %874 = vmatpush1.bf16.msra.mxu1 %v1373_v25  ;;  %897 = vmatprep.mubr.bf16.mxu1 %v1269_v0 }
 0x8e6   :  { %875 = vmatprep.subr.bf16.mxu1 %v1375_v26 }
 0x8e9   :  { %876 = vmatpush1.bf16.msra.mxu1 %v1380_v27 }
 0x8ea   :  { %877 = vmatprep.subr.bf16.mxu1 %v1384_v28 }
 0x8ed   :  { %878 = vmatpush1.bf16.msra.mxu1 %v1388_v29 }
 0x8ee   :  { %879 = vmatprep.subr.bf16.mxu1 %v1392_v31 }
 0x8f1   :  { %880 = vmatpush1.bf16.msra.mxu1 %v1397_v32 }
 0x9a4   :  { %v733_v14 = vpop.f32.mrf.mxu1 }
 0x9a6   :  { %v735_v15 = vpop.f32.mrf.mxu1 }
 0x9a7   :  { %v742_v30 = vcombine.low %v733_v14, %v735_v15 }
 0x9a8   :  { %v737_v33 = vpop.f32.mrf.mxu1 }
 0x9a9   :  { %v749_v34 = vrot.slane %v742_v30, %v1323_v45 }
 0x9aa   :  { %v738_v35 = vpop.f32.mrf.mxu1 }
 0x9ab   :  { %v751_v36 = vadd.f32 %v749_v34, %v347_v20 }
 0x9ad   :  { %v752_v37 = vmul.f32 %v751_v36, %v1326_v59 }
 0x9af   :  { %1195 = vtanh.f32 %v752_v37 }
 0x9bc   :  { %v1196_v38 = vpop.eup %1195 }
 0x9bd   :  { %762 = vrot.lane.b32.xlu1 %v1196_v38, %s1272_s8  ;;  %v754_v39 = vadd.f32 1.0, %v1196_v38  ;;  %v757_v20 = vrot.slane %v1196_v38, 2 }
 0x9bf   :  { %v755_v41 = vmul.f32 0.5, %v754_v39  ;;  %v759_v48 = vadd.f32 1.0, %v757_v20  ;;  %v1027_v20 = vrot.slane %v1369_v23, 4 }
 0x9c1   :  { %v761_v44 = vmul.f32 %v755_v41, %v688_v7  ;;  %v760_v49 = vmul.f32 0.5, %v759_v48 }
 0xa2f   :  { %v763_v40 = vpop.permute.xlu1 %762 }
 0xa30   :  { %v764_v42 = vrot.slane %v763_v40, 2 }
 0xa32   :  { %v766_v43 = vmul.f32 %v764_v42, %v755_v41 }
 0xa34   :  { %768 = vrot.lane.b32.xlu0 %v766_v43, %s1272_s8 }
 0xaa6   :  { %v769_v46 = vpop.permute.xlu0 %768 }
 0xaa7   :  { %v771_v9 = vadd.f32 %v769_v46, %v761_v44 }
 0xaa9   :  { %1197 = vtanh.f32 %v771_v9 }
 0xab6   :  { %v1198_v47 = vpop.eup %1197 }
 0xab7   :  { %774 = vrot.lane.b32.xlu1 %v1198_v47, %s1272_s8 }
 0xb29   :  { %v775_v50 = vpop.permute.xlu1 %774 }
 0xb2a   :  { %v777_v51 = vmul.f32 %v775_v50, %v760_v49  ;;  %v1029_v49 = vmul.f32 %v1027_v20, %v1326_v59 }
 0xb2c   :  { %v778_v52 = vpack.c.bf16 %v777_v51, %v777_v51  ;;  %v1129_v51 = vld [vmem:[%s1530_s3 + $0x4] ss:$0 sm:$0xff] }
 0xb2e   :  { %1126 = vmatmul.mubr.msk.bf16.vlgmr.msra.gmra.mxu0 %vm181_vm2, %v778_v52 }
 0xb2f   :  { %957 = vmatpush1.bf16.msra.mxu0 %v1373_v25  ;;  %980 = vmatprep.mubr.bf16.mxu0 %v1269_v0 }
 0xb30   :  { %958 = vmatprep.subr.bf16.mxu0 %v1375_v26 }
 0xb33   :  { %959 = vmatpush1.bf16.msra.mxu0 %v1380_v27 }
 0xb34   :  { %960 = vmatprep.subr.bf16.mxu0 %v1384_v28 }
 0xb37   :  { %961 = vmatpush1.bf16.msra.mxu0 %v1388_v29 }
 0xb38   :  { %962 = vmatprep.subr.bf16.mxu0 %v1392_v31 }
 0xb3b   :  { %963 = vmatpush1.bf16.msra.mxu0 %v1397_v32 }
 0xbee   :  { %v816_v53 = vpop.f32.mrf.mxu0 }
 0xbf0   :  { %v818_v54 = vpop.f32.mrf.mxu0 }
 0xbf1   :  { %v825_v55 = vcombine.low %v816_v53, %v818_v54  ;;  %v1063_v53 = vrot.slane %v1129_v51, %v1323_v45 }
 0xbf2   :  { %v820_v56 = vpop.f32.mrf.mxu0 }
 0xbf3   :  { %v832_v25 = vrot.slane %v825_v55, %v1323_v45 }
 0xbf4   :  { %v821_v57 = vpop.f32.mrf.mxu0 }
 0xbf5   :  { %v834_v0 = vadd.f32 %v832_v25, %v348_v21 }
 0xbf7   :  { %v835_v26 = vmul.f32 %v834_v0, %v1326_v59 }
 0xbf9   :  { %1199 = vtanh.f32 %v835_v26 }
 0xc06   :  { %v1200_v27 = vpop.eup %1199 }
 0xc07   :  { %845 = vrot.lane.b32.xlu0 %v1200_v27, %s1272_s8  ;;  %v837_v28 = vadd.f32 1.0, %v1200_v27  ;;  %v840_v16 = vrot.slane %v1200_v27, 2 }
 0xc09   :  { %v838_v31 = vmul.f32 0.5, %v837_v28  ;;  %v842_v18 = vadd.f32 1.0, %v840_v16 }
 0xc0b   :  { %v844_v60 = vmul.f32 %v838_v31, %v771_v9  ;;  %v843_v21 = vmul.f32 0.5, %v842_v18 }
 0xc79   :  { %v846_v29 = vpop.permute.xlu0 %845 }
 0xc7a   :  { %v847_v32 = vrot.slane %v846_v29, 2 }
 0xc7c   :  { %v849_v58 = vmul.f32 %v847_v32, %v838_v31 }
 0xc7e   :  { %851 = vrot.lane.b32.xlu1 %v849_v58, %s1272_s8 }
 0xcf0   :  { %v852_v61 = vpop.permute.xlu1 %851 }
 0xcf1   :  { %v854_v62 = vadd.f32 %v852_v61, %v844_v60 }
 0xcf3   :  { %1201 = vtanh.f32 %v854_v62 }
 0xd00   :  { %v1202_v63 = vpop.eup %1201 }
 0xd01   :  { %857 = vrot.lane.b32.xlu0 %v1202_v63, %s1272_s8 }
 0xd73   :  { %v858_v24 = vpop.permute.xlu0 %857 }
 0xd74   :  { %v860_v1 = vmul.f32 %v858_v24, %v843_v21 }
 0xd76   :  { %v861_v3 = vpack.c.bf16 %v860_v1, %v860_v1 }
 0xd78   :  { %1127 = vmatmul.mubr.msk.bf16.vlgmr.msra.gmra.mxu1 %vm181_vm2, %v861_v3 }
 0xe38   :  { %v899_v5 = vpop.f32.mrf.mxu1 }
 0xe3a   :  { %v901_v6 = vpop.f32.mrf.mxu1 }
 0xe3b   :  { %v908_v7 = vcombine.low %v899_v5, %v901_v6 }
 0xe3c   :  { %v903_v8 = vpop.f32.mrf.mxu1 }
 0xe3d   :  { %v915_v2 = vrot.slane %v908_v7, %v1323_v45 }
 0xe3e   :  { %v904_v4 = vpop.f32.mrf.mxu1 }
 0xe3f   :  { %v917_v10 = vadd.f32 %v915_v2, %v349_v22  ;;  %v1130_v2 = vld [vmem:[%s1530_s3 + $0x7] ss:$0 sm:$0xff] }
 0xe41   :  { %v918_v11 = vmul.f32 %v917_v10, %v1326_v59 }
 0xe43   :  { %1203 = vtanh.f32 %v918_v11 }
 0xe50   :  { %v1204_v12 = vpop.eup %1203 }
 0xe51   :  { %928 = vrot.lane.b32.xlu1 %v1204_v12, %s1272_s8  ;;  %v920_v13 = vadd.f32 1.0, %v1204_v12  ;;  %v923_v17 = vrot.slane %v1204_v12, 2 }
 0xe53   :  { %v921_v15 = vmul.f32 0.5, %v920_v13  ;;  %v925_v19 = vadd.f32 1.0, %v923_v17 }
 0xe55   :  { %v927_v34 = vmul.f32 %v921_v15, %v854_v62  ;;  %v926_v22 = vmul.f32 0.5, %v925_v19 }
 0xec3   :  { %v929_v14 = vpop.permute.xlu1 %928 }
 0xec4   :  { %v930_v30 = vrot.slane %v929_v14, 2 }
 0xec6   :  { %v932_v33 = vmul.f32 %v930_v30, %v921_v15 }
 0xec8   :  { %934 = vrot.lane.b32.xlu0 %v932_v33, %s1272_s8 }
 0xf3a   :  { %v935_v35 = vpop.permute.xlu0 %934 }
 0xf3b   :  { %v937_v36 = vadd.f32 %v935_v35, %v927_v34 }
 0xf3d   :  { %1205 = vtanh.f32 %v937_v36 }
 0xf4a   :  { %v1206_v37 = vpop.eup %1205 }
 0xf4b   :  { %940 = vrot.lane.b32.xlu1 %v1206_v37, %s1272_s8 }
 0xfbd   :  { %v941_v38 = vpop.permute.xlu1 %940 }
 0xfbe   :  { %v943_v39 = vmul.f32 %v941_v38, %v926_v22 }
 0xfc0   :  { %v944_v40 = vpack.c.bf16 %v943_v39, %v943_v39 }
 0xfc2   :  { %1128 = vmatmul.mubr.msk.bf16.vlgmr.msra.gmra.mxu0 %vm181_vm2, %v944_v40 }
0x1082   :  { %v982_v41 = vpop.f32.mrf.mxu0 }
0x1084   :  { %v984_v42 = vpop.f32.mrf.mxu0 }
0x1085   :  { %v991_v43 = vcombine.low %v982_v41, %v984_v42 }
0x1086   :  { %v986_v44 = vpop.f32.mrf.mxu0 }
0x1087   :  { %v998_v46 = vrot.slane %v991_v43, %v1323_v45 }
0x1088   :  { %v987_v9 = vpop.f32.mrf.mxu0 }
0x1089   :  { %v1000_v47 = vadd.f32 %v998_v46, %v1369_v23 }
0x108b   :  { %v1001_v48 = vmul.f32 %v1000_v47, %v1326_v59 }
0x108d   :  { %1207 = vtanh.f32 %v1001_v48 }
0x108e   :  { %1209 = vtanh.f32 %v1029_v49 }
0x109a   :  { %v1208_v50 = vpop.eup %1207 }
0x109b   :  { %1011 = vrot.lane.b32.xlu0 %v1208_v50, %s1272_s8  ;;  %v1210_v52 = vpop.eup %1209  ;;  %v1003_v23 = vadd.f32 1.0, %v1208_v50  ;;  %v1006_v21 = vrot.slane %v1208_v50, 2 }
0x109c   :  { %v1031_v59 = vadd.f32 1.0, %v1210_v52  ;;  %v1034_v28 = vrot.slane %v1210_v52, 2 }
0x109d   :  { %v1004_v55 = vmul.f32 0.5, %v1003_v23  ;;  %v1008_v24 = vadd.f32 1.0, %v1006_v21 }
0x109e   :  { %v1032_v0 = vmul.f32 0.5, %v1031_v59  ;;  %v1036_v29 = vadd.f32 1.0, %v1034_v28 }
0x109f   :  { %1038 = vrot.lane.b32.xlu0 %v1210_v52, %s1272_s8  ;;  %v1010_v62 = vmul.f32 %v1004_v55, %v937_v36  ;;  %v1009_v1 = vmul.f32 0.5, %v1008_v24 }
0x10a0   :  { %v1037_v31 = vmul.f32 0.5, %v1036_v29 }
0x10a3   :  { %1064 = vrot.lane.b32.xlu0 %v1063_v53, %s1272_s8 }
0x110d   :  { %v1012_v54 = vpop.permute.xlu0 %1011 }
0x110e   :  { %v1013_v56 = vrot.slane %v1012_v54, 2 }
0x1110   :  { %v1015_v25 = vmul.f32 %v1013_v56, %v1004_v55 }
0x1111   :  { %v1039_v57 = vpop.permute.xlu0 %1038 }
0x1112   :  { %v1040_v26 = vrot.slane %v1039_v57, 2  ;;  %1017 = vrot.lane.b32.xlu1 %v1015_v25, %s1272_s8 }
0x1114   :  { %v1042_v27 = vmul.f32 %v1040_v26, %v1032_v0 }
0x1115   :  { %v1065_v45 = vpop.permute.xlu0 %1064 }
0x1116   :  { %1211 = vtanh.f32 %v1042_v27 }
0x1123   :  { %v1212_v32 = vpop.eup %1211 }
0x1124   :  { %v1044_v58 = vmul.f32 %v1212_v32, %v1037_v31 }
0x1126   :  { %v1067_v60 = vmul.f32 %v1065_v45, %v1044_v58 }
0x1128   :  { %v1068_v61 = vsel %vm1053_vm3, %v1067_v60, 0.0 }
0x1129   :  { %1069 = vadd.xlane.f32.xlu0 %v1068_v61 }
0x1184   :  { %v1018_v63 = vpop.permute.xlu1 %1017 }
0x1185   :  { %v1020_v16 = vadd.f32 %v1018_v63, %v1010_v62 }
0x1187   :  { %1213 = vtanh.f32 %v1020_v16 }
0x1194   :  { %v1214_v18 = vpop.eup %1213 }
0x1195   :  { %1023 = vrot.lane.b32.xlu1 %v1214_v18, %s1272_s8 }
0x11b2   :  { %v1070_v8 = vpop.xlane.xlu0 %1069 }
0x1207   :  { %v1024_v3 = vpop.permute.xlu1 %1023 }
0x1208   :  { %v1026_v5 = vmul.f32 %v1024_v3, %v1009_v1 }
0x120a   :  { %v1052_v6 = vmul.f32 %v1129_v51, %v1026_v5 }
0x120c   :  { %v1054_v7 = vsel %vm1053_vm3, %v1052_v6, 0.0 }
0x120d   :  { %1055 = vadd.xlane.f32.xlu1 %v1054_v7 }
0x1296   :  { %v1056_v4 = vpop.xlane.xlu1 %1055 }
0x1297   :  { %v1071_v10 = vadd.f32 %v1070_v8, %v1056_v4 }
0x1299   :  { %v1079_v11 = vadd.f32 %v1130_v2, %v1071_v10 }
0x129b   :  { %v1131_v12 = vmul.f32 -1.442695, %v1079_v11 }
0x129d   :  { %1215 = vpow2.f32 %v1131_v12 }
0x12aa   :  { %v1216_v13 = vpop.eup %1215 }
0x12ab   :  { %v1083_v14 = vadd.f32 1.0, %v1216_v13 }
0x12ad   :  { %1217 = vrcp.f32 %v1083_v14 }
0x12ba   :  { %v1218_v15 = vpop.eup %1217 }
0x12bb   :  { %1087 = vst.msk [vmem:[%s1531_s4] sm:$0x3] %vm1086_vm4, %v1218_v15 }
0x12bc   :  { %1092 = vsyncpa [#allocation3], 1 }
0x12bd   :  { %1093 = vsyncpa [#allocation5], 1 }

</bundles_post_ra>
